<compile_context>
chip_gen: v7x
topology: tpu7x:2x2x1
jax: 0.10.0
libtpu: 0.0.40
codegen_flags: <defaults>
</compile_context>

<pallas_src>
import math

import jax
import jax.numpy as jnp
from jax.experimental import pallas as pl
from jax.experimental.pallas import tpu as pltpu


def mask_head_kernel(x_ref, w1_ref, b1_ref, w2_ref, b2_ref, o_ref):
    # x_ref:  (1, C_in, TS)          spatial tile of the (free-reshaped) NCHW input
    # w1_ref: (4*C_mid, C_in)        all 4 ConvTranspose taps fused along rows
    # b1_ref: (4*C_mid, 1)
    # w2_ref: (4*num_cls, 4*C_mid)   block-diagonal 1x1-conv weights (one w2 block per tap)
    # b2_ref: (4*num_cls, 1)
    # o_ref:  (1, 4*num_cls, TS)     lane-dense output (TS is a multiple of 128)
    x = x_ref[0]
    y = jnp.dot(w1_ref[...], x, preferred_element_type=jnp.float32) + b1_ref[...]
    y = jnp.maximum(y, 0.0)                                            # ReLU
    z = jnp.dot(w2_ref[...], y, preferred_element_type=jnp.float32) + b2_ref[...]
    o_ref[0] = jax.nn.sigmoid(z).astype(o_ref.dtype)                   # eval-mode sigmoid


def mask_head_forward(x, params, *, max_tile_s=2048):
    """x: (N, C_in, H, W) float32 NCHW. Returns (N, num_cls, 2H, 2W)."""
    w1, b1, w2, b2 = params
    N, C_in, H, W = x.shape
    C_mid = w1.shape[1]
    num_cls = w2.shape[0]
    HW = H * W

    # Lane-dense spatial tile: multiple of 128, as large as reasonable (few grid steps).
    tile_s = min(max_tile_s, ((HW + 127) // 128) * 128)
    hw_pad = ((HW + tile_s - 1) // tile_s) * tile_s

    xm = x.reshape(N, C_in, HW)                        # free reshape — no HBM transpose
    if hw_pad != HW:
        xm = jnp.pad(xm, ((0, 0), (0, 0), (0, hw_pad - HW)))

    # Fuse the 4 taps along the output-channel axis: row = (kh*2+kw)*C_mid + o.
    w1k = jnp.transpose(w1, (2, 3, 1, 0)).reshape(4 * C_mid, C_in)       # (4*C_mid, C_in)
    b1k = jnp.tile(b1, 4).reshape(4 * C_mid, 1)
    # Block-diagonal 1x1 conv: one (num_cls, C_mid) block per tap.
    w2m = w2.reshape(num_cls, C_mid)
    w2k = jnp.kron(jnp.eye(4, dtype=w2m.dtype), w2m)                     # (4*num_cls, 4*C_mid)
    b2k = jnp.tile(b2, 4).reshape(4 * num_cls, 1)

    grid = (N, hw_pad // tile_s)

    out = pl.pallas_call(
        mask_head_kernel,
        out_shape=jax.ShapeDtypeStruct((N, 4 * num_cls, hw_pad), jnp.float32),
        grid_spec=pltpu.PrefetchScalarGridSpec(
            num_scalar_prefetch=0,
            grid=grid,
            in_specs=[
                pl.BlockSpec((1, C_in, tile_s), lambda n, s: (n, 0, s)),
                pl.BlockSpec((4 * C_mid, C_in), lambda n, s: (0, 0)),
                pl.BlockSpec((4 * C_mid, 1), lambda n, s: (0, 0)),
                pl.BlockSpec((4 * num_cls, 4 * C_mid), lambda n, s: (0, 0)),
                pl.BlockSpec((4 * num_cls, 1), lambda n, s: (0, 0)),
            ],
            out_specs=pl.BlockSpec((1, 4 * num_cls, tile_s), lambda n, s: (n, 0, s)),
        ),
        compiler_params=pltpu.CompilerParams(
            dimension_semantics=("parallel", "parallel")),
    )(xm, w1k, b1k, w2k, b2k)

    # Scatter the fused taps back into the upsampled NCHW grid (single pass over the output).
    out = out[:, :, :HW].reshape(N, 2, 2, num_cls, H, W)   # (n, kh, kw, c, h, w)
    out = jnp.transpose(out, (0, 3, 4, 1, 5, 2))           # (n, c, h, kh, w, kw)
    return out.reshape(N, num_cls, 2 * H, 2 * W)


def init_params(key, dim_in, dim_internal, num_cls):
    """Deterministic synthetic parameters matching MaskHead.__init__ shapes.
    Mimics kaiming_uniform_ bounds; biases are zero (as in _init_weights)."""
    k1, k2 = jax.random.split(key)
    # ConvTranspose2d weight: (dim_in, dim_internal, 2, 2); PyTorch fan_in = dim_internal * 4
    fan_in1 = dim_internal * 4
    bound1 = math.sqrt(2.0) * math.sqrt(3.0 / fan_in1)
    w1 = jax.random.uniform(k1, (dim_in, dim_internal, 2, 2), jnp.float32, -bound1, bound1)
    b1 = jnp.zeros((dim_internal,), jnp.float32)
    # Conv2d 1x1 weight: (num_cls, dim_internal, 1, 1); fan_in = dim_internal
    fan_in2 = dim_internal
    bound2 = math.sqrt(2.0) * math.sqrt(3.0 / fan_in2)
    w2 = jax.random.uniform(k2, (num_cls, dim_internal, 1, 1), jnp.float32, -bound2, bound2)
    b2 = jnp.zeros((num_cls,), jnp.float32)
    return w1, b1, w2, b2


def reference_forward(x, params):
    """Pure-JAX transcription of the PyTorch forward (eval mode) for checking."""
    w1, b1, w2, b2 = params
    N, C_in, H, W = x.shape
    C_mid = w1.shape[1]
    num_cls = w2.shape[0]
    # ConvTranspose2d k=2, s=2, p=0: out[n,o,2h+kh,2w+kw] = sum_i x[n,i,h,w] * w1[i,o,kh,kw] + b1[o]
    y = jnp.einsum('nihw,iokl->nohkwl', x, w1)              # (N, C_mid, H, 2, W, 2)
    y = y.reshape(N, C_mid, 2 * H, 2 * W) + b1[None, :, None, None]
    y = jnp.maximum(y, 0.0)
    z = jnp.einsum('nchw,oc->nohw', y, w2.reshape(num_cls, C_mid)) + b2[None, :, None, None]
    return jax.nn.sigmoid(z)


if __name__ == "__main__":
    # Small shapes consistent with the module (dim_in, dim_internal, num_cls arbitrary).
    N, DIM_IN, DIM_INTERNAL, NUM_CLS, H, W = 2, 32, 32, 8, 16, 16

    key = jax.random.PRNGKey(0)
    kx, kp = jax.random.split(key)
    x = jax.random.normal(kx, (N, DIM_IN, H, W), jnp.float32)
    params = init_params(kp, DIM_IN, DIM_INTERNAL, NUM_CLS)

    out = mask_head_forward(x, params)
    out = jax.block_until_ready(out)

    ref = reference_forward(x, params)
    assert out.shape == (N, NUM_CLS, 2 * H, 2 * W), out.shape
    assert jnp.allclose(out, ref, atol=1e-5, rtol=1e-5), "mismatch vs reference"

    print("KERNEL_OK")
</pallas_src>

<mosaic_0001>
module attributes {stable_mosaic.version = 11 : i64} {
  func.func @mask_head_kernel(%arg0: i32, %arg1: i32, %arg2: memref<1x32x256xf32, #tpu.memory_space<vmem>>, %arg3: memref<128x32xf32, #tpu.memory_space<vmem>>, %arg4: memref<128x1xf32, #tpu.memory_space<vmem>>, %arg5: memref<32x128xf32, #tpu.memory_space<vmem>>, %arg6: memref<32x1xf32, #tpu.memory_space<vmem>>, %arg7: memref<1x32x256xf32, #tpu.memory_space<vmem>>) attributes {dimension_semantics = [#tpu.dimension_semantics<parallel>, #tpu.dimension_semantics<parallel>], iteration_bounds = array<i64: 2, 1>, scalar_prefetch = 0 : i64, scratch_operands = 0 : i64, tpu.core_type = #tpu.core_type<tc>, window_params = [{transform_indices = @transform_0, window_bounds = array<i64: 1, 32, 256>}, {pipeline_mode = #tpu.pipeline_mode<synchronous>, transform_indices = @transform_1, window_bounds = array<i64: 128, 32>}, {pipeline_mode = #tpu.pipeline_mode<synchronous>, transform_indices = @transform_2, window_bounds = array<i64: 128, 1>}, {pipeline_mode = #tpu.pipeline_mode<synchronous>, transform_indices = @transform_3, window_bounds = array<i64: 32, 128>}, {pipeline_mode = #tpu.pipeline_mode<synchronous>, transform_indices = @transform_4, window_bounds = array<i64: 32, 1>}, {transform_indices = @transform_5, window_bounds = array<i64: 1, 32, 256>}]} {
    %c0 = arith.constant 0 : index
    %c0_0 = arith.constant 0 : index
    %c0_1 = arith.constant 0 : index
    %0 = vector.load %arg2[%c0, %c0_0, %c0_1] : memref<1x32x256xf32, #tpu.memory_space<vmem>>, vector<1x32x256xf32>
    %1 = vector.shape_cast %0 : vector<1x32x256xf32> to vector<32x256xf32>
    %c0_2 = arith.constant 0 : index
    %c0_3 = arith.constant 0 : index
    %2 = vector.load %arg3[%c0_2, %c0_3] : memref<128x32xf32, #tpu.memory_space<vmem>>, vector<128x32xf32>
    %cst = arith.constant dense<0.000000e+00> : vector<128x256xf32>
    %3 = tpu.matmul %2, %1, %cst {dimension_numbers = #tpu.dot_dimension_numbers<[1], [0], [0], [1], [0, 0, 1, 1], [], []>} : vector<128x32xf32>, vector<32x256xf32>, vector<128x256xf32> -> vector<128x256xf32>
    %c0_4 = arith.constant 0 : index
    %c0_5 = arith.constant 0 : index
    %4 = vector.load %arg4[%c0_4, %c0_5] : memref<128x1xf32, #tpu.memory_space<vmem>>, vector<128x1xf32>
    %5 = vector.broadcast %4 : vector<128x1xf32> to vector<128x256xf32>
    %6 = arith.addf %3, %5 : vector<128x256xf32>
    %cst_6 = arith.constant 0.000000e+00 : f32
    %7 = vector.broadcast %cst_6 : f32 to vector<128x256xf32>
    %8 = arith.maximumf %6, %7 : vector<128x256xf32>
    %c0_7 = arith.constant 0 : index
    %c0_8 = arith.constant 0 : index
    %9 = vector.load %arg5[%c0_7, %c0_8] : memref<32x128xf32, #tpu.memory_space<vmem>>, vector<32x128xf32>
    %cst_9 = arith.constant dense<0.000000e+00> : vector<32x256xf32>
    %10 = tpu.matmul %9, %8, %cst_9 {dimension_numbers = #tpu.dot_dimension_numbers<[1], [0], [0], [1], [0, 0, 1, 1], [], []>} : vector<32x128xf32>, vector<128x256xf32>, vector<32x256xf32> -> vector<32x256xf32>
    %c0_10 = arith.constant 0 : index
    %c0_11 = arith.constant 0 : index
    %11 = vector.load %arg6[%c0_10, %c0_11] : memref<32x1xf32, #tpu.memory_space<vmem>>, vector<32x1xf32>
    %12 = vector.broadcast %11 : vector<32x1xf32> to vector<32x256xf32>
    %13 = arith.addf %10, %12 : vector<32x256xf32>
    %14 = arith.negf %13 : vector<32x256xf32>
    %15 = math.exp %14 : vector<32x256xf32>
    %cst_12 = arith.constant 1.000000e+00 : f32
    %16 = vector.broadcast %cst_12 : f32 to vector<32x256xf32>
    %17 = arith.addf %16, %15 : vector<32x256xf32>
    %18 = arith.divf %16, %17 : vector<32x256xf32>
    %c0_13 = arith.constant 0 : index
    %c0_14 = arith.constant 0 : index
    %c0_15 = arith.constant 0 : index
    %19 = vector.load %arg7[%c0_13, %c0_14, %c0_15] : memref<1x32x256xf32, #tpu.memory_space<vmem>>, vector<1x32x256xf32>
    %20 = vector.shape_cast %19 : vector<1x32x256xf32> to vector<32x256xf32>
    %21 = vector.shape_cast %18 : vector<32x256xf32> to vector<1x32x256xf32>
    tpu.vector_store %arg7[%c0_13, %c0_14, %c0_15], %21 {strides = array<i32>} : memref<1x32x256xf32, #tpu.memory_space<vmem>>, vector<1x32x256xf32>,
    return
  }
  func.func @transform_0(%arg0: i32, %arg1: i32) -> (i32, i32, i32) {
    %c0_i32 = arith.constant 0 : i32
    %c0_i32_0 = arith.constant 0 : i32
    return %arg0, %c0_i32, %arg1 : i32, i32, i32
  }
  func.func @transform_1(%arg0: i32, %arg1: i32) -> (i32, i32) {
    %c0_i32 = arith.constant 0 : i32
    %c0_i32_0 = arith.constant 0 : i32
    %c0_i32_1 = arith.constant 0 : i32
    return %c0_i32, %c0_i32_0 : i32, i32
  }
  func.func @transform_2(%arg0: i32, %arg1: i32) -> (i32, i32) {
    %c0_i32 = arith.constant 0 : i32
    %c0_i32_0 = arith.constant 0 : i32
    %c0_i32_1 = arith.constant 0 : i32
    return %c0_i32, %c0_i32_0 : i32, i32
  }
  func.func @transform_3(%arg0: i32, %arg1: i32) -> (i32, i32) {
    %c0_i32 = arith.constant 0 : i32
    %c0_i32_0 = arith.constant 0 : i32
    %c0_i32_1 = arith.constant 0 : i32
    return %c0_i32, %c0_i32_0 : i32, i32
  }
  func.func @transform_4(%arg0: i32, %arg1: i32) -> (i32, i32) {
    %c0_i32 = arith.constant 0 : i32
    %c0_i32_0 = arith.constant 0 : i32
    %c0_i32_1 = arith.constant 0 : i32
    return %c0_i32, %c0_i32_0 : i32, i32
  }
  func.func @transform_5(%arg0: i32, %arg1: i32) -> (i32, i32, i32) {
    %c0_i32 = arith.constant 0 : i32
    %c0_i32_0 = arith.constant 0 : i32
    return %arg0, %c0_i32, %arg1 : i32, i32, i32
  }
}

</mosaic_0001>

<bundles_post_ra>
// kernel: tpu_custom_call.1
= control target key start
LH: loop header
LB: loop body
LE: loop exit
PB: predicated region body
PF: predicated region fallthrough
CT: control target
= control target key end

     0   :  { %10 = vsyncpa [#allocation3], 0  ;;  %s1446_s0 = inlined_call_operand.vmem [shape: f32[2,32,256], index: 0, kind: input, shape index: {}]   ;;  %s1447_s1 = inlined_call_operand.vmem [shape: f32[128,32], index: 1, kind: input, shape index: {}]   ;;  %s1448_s2 = inlined_call_operand.vmem [shape: f32[128,1], index: 2, kind: input, shape index: {}]   ;;  %s1449_s3 = inlined_call_operand.vmem [shape: f32[32,128], index: 3, kind: input, shape index: {}]   ;;  %s1450_s4 = inlined_call_operand.vmem [shape: f32[32,1], index: 4, kind: input, shape index: {}]   ;;  %s1451_s5 = inlined_call_operand.hbm [shape: f32[2,32,256], index: 5, kind: output, shape index: {}]  }
   0x1   :  { %12 = vsyncpa [#allocation3 + $0x1], 0  ;;  %s1171_s18 = smov 0   ;;  %s1173_s19 = smov 0  }
   0x2   :  { %s1175_s20 = smov 0   ;;  %s1177_s21 = smov 0  }
   0x3   :  { %s1179_s22 = smov 0   ;;  %s1181_s23 = smov 0  }
   0x4 LB: > { %s884_s24 = sadd.s32 4294967295, %s1134_s23   ;;  %s885_s25 = sadd.s32 4294967294, %s1134_s23   ;;  %s1134_s23 = sphi %s1181_s23, %s18_s23   ;;  %s1130_s22 = sphi %s1179_s22, %s1458_s22   ;;  %s1126_s21 = sphi %s1177_s21, %s1457_s21   ;;  %s1122_s20 = sphi %s1175_s20, %s1456_s20   ;;  %s1118_s19 = sphi %s1173_s19, %s1455_s19   ;;  %s1114_s18 = sphi %s1171_s18, %s1454_s18  }
   0x5   : > { %s30_s26 = sadd.s32 1, %s1130_s22  ;;  %s151_s27 = sadd.s32 1, %s1122_s20 }
   0x6   : > { %p32_p0 = scmp.ge.s32.totalorder %s30_s26, 2  ;;  %p161_p1 = scmp.ne.s32.totalorder %s1122_s20, %s1118_s19 }
   0x7   : > { %p162_p2 = scmp.eq.s32.totalorder %s884_s24, 1  ;;  %p167_p3 = scmp.ne.s32.totalorder %s1118_s19, %s1114_s18 }
   0x8   : > { %s1460_s26 = smov (%p32_p0, %s30_s26), 0  ;;  %p168_p5 = scmp.eq.s32.totalorder %s885_s25, 1 }
   0x9   : > { %p1211_p4 = por %p162_p2, %p161_p1  ;;  %s146_s29 = ssub.s32 %s1130_s22, %s1460_s26 }
   0xa   : > { %p888_p6 = scmp.ge.s32.totalorder %s1134_s23, 1  ;;  %p149_p7 = scmp.eq.s32.totalorder %s146_s29, 0 }
   0xb   : > { %p1218_p8 = por %p168_p5, %p167_p3  ;;  %p211_p9 = scmp.lt.s32.totalorder %s1134_s23, 3 }
   0xc   : > { %s1224_s6 = scalar_select %p149_p7, %s1122_s20, %s151_s27  }
   0xd   : > { %p212_p10 = pnand %p888_p6, %p211_p9 }
   0xe   : > { %p244_p11 = scmp.lt.s32.totalorder (!%p212_p10), %s1126_s21, 1  ;;  %v1136_v0 = vmov (!%p212_p10), 0.0   ;;  %v1137_v1 = vmov (!%p212_p10), 0   ;;  %v278_v2 = vld [vmem:[%s1448_s2] sm:$0xff] (!%p212_p10)  ;;  %v280_v3 = vld [vmem:[%s1448_s2 + $0x10] sm:$0xff] (!%p212_p10)  ;;  %v279_v15 = vld [vmem:[%s1448_s2 + $0x8] sm:$0xff] (!%p212_p10) }
   0xf   : > { %215 = sbr.rel (%p212_p10) target bundleno = 590 (0x24e), region = 40  ;;  %487 = vmatprep.mubr.f32.mxu0 (!%p212_p10), %v1136_v0  ;;  %708 = vmatprep.mubr.f32.mxu1 (!%p212_p10), %v1136_v0  ;;  %v281_v16 = vld [vmem:[%s1448_s2 + $0x18] sm:$0xff] (!%p212_p10)  ;;  %v282_v18 = vld [vmem:[%s1448_s2 + $0x20] sm:$0xff] (!%p212_p10)  ;;  %v283_v19 = vld [vmem:[%s1448_s2 + $0x28] sm:$0xff] (!%p212_p10)  ;;  %vm374_vm0 = vcmask (!%p212_p10), 261120   ;;  %s240_s17 = sand.u32 (!%p212_p10), 1, %s1118_s19  }
  0x10   : > { %1022 = vset.pattern.permute.xlu0 (!%p212_p10), %v1137_v1  ;;  %1023 = vset.pattern.permute.xlu1 (!%p212_p10), %v1137_v1  ;;  %v262_v20 = vld [vmem:[%s1447_s1] sm:$0xff] (!%p212_p10)  ;;  %v284_v21 = vld [vmem:[%s1448_s2 + $0x30] sm:$0xff] (!%p212_p10)  ;;  %v285_v22 = vld [vmem:[%s1448_s2 + $0x38] sm:$0xff] (!%p212_p10)  ;;  %s889_s24 = sshll.u32 (!%p212_p10), %s240_s17, 6  ;;  %s922_s27 = sshll.u32 (!%p212_p10), %s1126_s21, 10 }
  0x11   : > { %296 = vperm.xlu0 (!%p212_p10), %1022, %v278_v2   ;;  %306 = vperm.xlu1 (!%p212_p10), %1023, %v280_v3   ;;  %v263_v23 = vld [vmem:[%s1447_s1 + $0x8] sm:$0xff] (!%p212_p10)  ;;  %v286_v24 = vld [vmem:[%s1448_s2 + $0x40] sm:$0xff] (!%p212_p10)  ;;  %v264_v26 = vld [vmem:[%s1447_s1 + $0x10] sm:$0xff] (!%p212_p10)  ;;  %s242_s25 = scalar_lea.vmem (!%p212_p10), [#allocation2], %s889_s24  ;;  %s1394_s9 = scalar_lea.hbm (!%p212_p10), %s1451_s5, %s922_s27 }
  0x12   : > { %v287_v25 = vld [vmem:[%s1448_s2 + $0x48] sm:$0xff] (!%p212_p10)  ;;  %v288_v27 = vld [vmem:[%s1448_s2 + $0x50] sm:$0xff] (!%p212_p10)  ;;  %v289_v28 = vld [vmem:[%s1448_s2 + $0x58] sm:$0xff] (!%p212_p10)  ;;  %s805_s29 = sshll.u32 (!%p212_p10), %s242_s25, 4  ;;  %s1400_s10 = scalar_lea.sflag (!%p212_p10), [#allocation3], %s240_s17  ;;  %s1396_s29 = int_to_ptr.vmem [resolvable:$true] %s805_s29 }
  0x13   : > { %v265_v29 = vld [vmem:[%s1447_s1 + $0x18] sm:$0xff] (!%p212_p10)  ;;  %v290_v30 = vld [vmem:[%s1448_s2 + $0x60] sm:$0xff] (!%p212_p10)  ;;  %v291_v31 = vld [vmem:[%s1448_s2 + $0x68] sm:$0xff] (!%p212_p10) }
  0x14   : > { %v266_v32 = vld [vmem:[%s1447_s1 + $0x20] sm:$0xff] (!%p212_p10)  ;;  %v292_v33 = vld [vmem:[%s1448_s2 + $0x70] sm:$0xff] (!%p212_p10)  ;;  %v293_v34 = vld [vmem:[%s1448_s2 + $0x78] sm:$0xff] (!%p212_p10) }
  0x15   : > { %301 = vperm.xlu0 (!%p212_p10), %1022, %v279_v15   ;;  %311 = vperm.xlu1 (!%p212_p10), %1023, %v281_v16   ;;  %v267_v35 = vld [vmem:[%s1447_s1 + $0x28] sm:$0xff] (!%p212_p10)  ;;  %v620_v36 = vld [vmem:[%s1450_s4] sm:$0xff] (!%p212_p10)  ;;  %v268_v38 = vld [vmem:[%s1447_s1 + $0x30] sm:$0xff] (!%p212_p10) }
  0x16   : > { %s245_s7 = scalar_select %p244_p11, %s1126_s21, 1  ;;  %v621_v37 = vld [vmem:[%s1450_s4 + $0x8] sm:$0xff]  ;;  %v622_v39 = vld [vmem:[%s1450_s4 + $0x10] sm:$0xff]  ;;  %v623_v40 = vld [vmem:[%s1450_s4 + $0x18] sm:$0xff] }
  0x17   : > { %v269_v41 = vld [vmem:[%s1447_s1 + $0x38] sm:$0xff]  ;;  %v270_v42 = vld [vmem:[%s1447_s1 + $0x40] sm:$0xff]  ;;  %v271_v43 = vld [vmem:[%s1447_s1 + $0x48] sm:$0xff]  ;;  %s1138_s21 = smov [#allocation2]  }
  0x18   : > { %s921_s8 = sshll.u32 %s245_s7, 6  ;;  %v272_v44 = vld [vmem:[%s1447_s1 + $0x50] sm:$0xff]  ;;  %v273_v45 = vld [vmem:[%s1447_s1 + $0x58] sm:$0xff]  ;;  %v274_v46 = vld [vmem:[%s1447_s1 + $0x60] sm:$0xff]  ;;  %s1060_s12 = sshll.u32 %s1138_s21, 4  ;;  %s1061_s12 = int_to_ptr.vmem [resolvable:$false] %s1060_s12 }
  0x19   : > { %s251_s11 = scalar_lea.vmem %s1446_s0, %s921_s8  ;;  %316 = vperm.xlu0 %1022, %v282_v18   ;;  %321 = vperm.xlu1 %1023, %v283_v19   ;;  %v275_v47 = vld [vmem:[%s1447_s1 + $0x68] sm:$0xff]  ;;  %v276_v48 = vld [vmem:[%s1447_s1 + $0x70] sm:$0xff]  ;;  %v277_v49 = vld [vmem:[%s1447_s1 + $0x78] sm:$0xff]  ;;  %s1062_s13 = scalar_lea.vmem %s1061_s12, 2048 }
  0x1a   : > { %v255_v4 = vld [vmem:[%s251_s11 + $0x8] sm:$0xff]  ;;  %v257_v5 = vld [vmem:[%s251_s11 + $0x18] sm:$0xff]  ;;  %v254_v6 = vld [vmem:[%s251_s11] sm:$0xff]  ;;  %p1063_p1 = scmp.lt.s32.totalorder %s1396_s29, %s1061_s12 }
  0x1b   : > { %v923_v7 = vpack.c.bf16 %v257_v5, %v255_v4  ;;  %v256_v8 = vld [vmem:[%s251_s11 + $0x10] sm:$0xff]  ;;  %v259_v9 = vld [vmem:[%s251_s11 + $0x28] sm:$0xff]  ;;  %v261_v10 = vld [vmem:[%s251_s11 + $0x38] sm:$0xff] }
  0x1c   : > { %v925_v11 = vpack.c.bf16 %v256_v8, %v254_v6  ;;  %v927_v12 = vpack.c.bf16 %v261_v10, %v259_v9  ;;  %v258_v13 = vld [vmem:[%s251_s11 + $0x20] sm:$0xff]  ;;  %v260_v14 = vld [vmem:[%s251_s11 + $0x30] sm:$0xff]  ;;  %s1056_s11 = scalar_lea.vmem %s1396_s29, 1024 }
  0x1d   : > { %924 = vmatprep.subr.bf16.mxu0 %v923_v7  ;;  %v929_v17 = vpack.c.bf16 %v260_v14, %v258_v13  ;;  %326 = vperm.xlu0 %1022, %v284_v21   ;;  %p1057_p12 = scmp.ne.s32.totalorder %s1396_s29, %s1056_s11  ;;  %p1064_p2 = scmp.lt.s32.totalorder %s1062_s13, %s1056_s11 }
  0x1e   : > { %926 = vmatpush1.bf16.msra.mxu0 %v925_v11  ;;  %331 = vperm.xlu1 %1023, %v285_v22  }
  0x1f   : > { %928 = vmatprep.subr.bf16.mxu0 %v927_v12  ;;  %p1058_p13 = pnand %p1057_p12, %p1211_p4  ;;  %p1065_p3 = por %p1064_p2, %p1063_p1 }
  0x21   : > { %336 = vperm.xlu0 %1022, %v286_v24   ;;  %p1059_p0 = pneg %p1058_p13 }
  0x22   : > { %930 = vmatpush1.bf16.msra.mxu0 %v929_v17  ;;  %341 = vperm.xlu1 %1023, %v287_v25  }
  0x23   : > { %p1066_p5 = pnand %p1065_p3, %p1059_p0 }
  0x25   : > { %892 = vmatmul.mubr.msk.f32.vlgmr.msra.gmra.mrb[0].mxu0 %vm374_vm0, %v262_v20  ;;  %346 = vperm.xlu0 %1022, %v288_v27  }
  0x26   : > { %493 = vmatprep.mubr.f32.mxu0 %v1136_v0  ;;  %351 = vperm.xlu1 %1023, %v289_v28  }
  0x29   : > { %893 = vmatmul.mubr.msk.f32.gmra.mrb[2].mxu0 %vm374_vm0, %v263_v23  ;;  %356 = vperm.xlu0 %1022, %v290_v30  }
  0x2a   : > { %499 = vmatprep.mubr.f32.mxu0 %v1136_v0  ;;  %361 = vperm.xlu1 %1023, %v291_v31  }
  0x2d   : > { %894 = vmatmul.mubr.msk.f32.gmra.mrb[4].mxu0 %vm374_vm0, %v264_v26  ;;  %366 = vperm.xlu0 %1022, %v292_v33  }
  0x2e   : > { %505 = vmatprep.mubr.f32.mxu0 %v1136_v0  ;;  %371 = vperm.xlu1 %1023, %v293_v34  }
  0x31   : > { %895 = vmatmul.mubr.msk.f32.gmra.mrb[6].mxu0 %vm374_vm0, %v265_v29  ;;  %626 = vperm.xlu0 %1022, %v620_v36  }
  0x32   : > { %511 = vmatprep.mubr.f32.mxu0 %v1136_v0  ;;  %631 = vperm.xlu1 %1023, %v621_v37  }
  0x35   : > { %896 = vmatmul.mubr.msk.f32.gmra.mrb[8].mxu0 %vm374_vm0, %v266_v32  ;;  %636 = vperm.xlu0 %1022, %v622_v39  }
  0x36   : > { %517 = vmatprep.mubr.f32.mxu0 %v1136_v0  ;;  %641 = vperm.xlu1 %1023, %v623_v40  }
  0x39   : > { %897 = vmatmul.mubr.msk.f32.gmra.mrb[10].mxu0 %vm374_vm0, %v267_v35 }
  0x3a   : > { %523 = vmatprep.mubr.f32.mxu0 %v1136_v0 }
  0x3d   : > { %898 = vmatmul.mubr.msk.f32.gmra.mrb[12].mxu0 %vm374_vm0, %v268_v38 }
  0x3e   : > { %529 = vmatprep.mubr.f32.mxu0 %v1136_v0 }
  0x41   : > { %899 = vmatmul.mubr.msk.f32.gmra.mrb[14].mxu0 %vm374_vm0, %v269_v41 }
  0x42   : > { %535 = vmatprep.mubr.f32.mxu0 %v1136_v0 }
  0x45   : > { %900 = vmatmul.mubr.msk.f32.gmra.mrb[16].mxu0 %vm374_vm0, %v270_v42 }
  0x46   : > { %541 = vmatprep.mubr.f32.mxu0 %v1136_v0 }
  0x49   : > { %901 = vmatmul.mubr.msk.f32.gmra.mrb[18].mxu0 %vm374_vm0, %v271_v43 }
  0x4a   : > { %547 = vmatprep.mubr.f32.mxu0 %v1136_v0 }
  0x4d   : > { %902 = vmatmul.mubr.msk.f32.gmra.mrb[20].mxu0 %vm374_vm0, %v272_v44 }
  0x4e   : > { %553 = vmatprep.mubr.f32.mxu0 %v1136_v0 }
  0x51   : > { %903 = vmatmul.mubr.msk.f32.gmra.mrb[22].mxu0 %vm374_vm0, %v273_v45 }
  0x52   : > { %559 = vmatprep.mubr.f32.mxu0 %v1136_v0 }
  0x55   : > { %904 = vmatmul.mubr.msk.f32.gmra.mrb[24].mxu0 %vm374_vm0, %v274_v46 }
  0x56   : > { %565 = vmatprep.mubr.f32.mxu0 %v1136_v0 }
  0x59   : > { %905 = vmatmul.mubr.msk.f32.gmra.mrb[26].mxu0 %vm374_vm0, %v275_v47 }
  0x5a   : > { %571 = vmatprep.mubr.f32.mxu0 %v1136_v0 }
  0x5d   : > { %906 = vmatmul.mubr.msk.f32.gmra.mrb[28].mxu0 %vm374_vm0, %v276_v48 }
  0x5e   : > { %577 = vmatprep.mubr.f32.mxu0 %v1136_v0 }
  0x61   : > { %907 = vmatmul.mubr.msk.f32.gmra.mrb[30].mxu0 %vm374_vm0, %v277_v49 }
  0x90   : > { %v297_v50 = vpop.permute.xlu0 %296  ;;  %v307_v59 = vpop.permute.xlu1 %306 }
  0x94   : > { %v302_v54 = vpop.permute.xlu0 %301  ;;  %v312_v7 = vpop.permute.xlu1 %311 }
  0x98   : > { %v317_v20 = vpop.permute.xlu0 %316  ;;  %v322_v23 = vpop.permute.xlu1 %321 }
  0x9c   : > { %v327_v36 = vpop.permute.xlu0 %326 }
  0x9d   : > { %v332_v39 = vpop.permute.xlu1 %331 }
  0xf8   : > { %v489_v51 = vpop.f32.mrb[0].mxu0 }
  0xf9   : > { %v491_v52 = vpop.f32.mrb[1].mxu0  ;;  %v490_v53 = vadd.f32 %v489_v51, %v297_v50 }
  0xfa   : > { %v492_v55 = vadd.f32 %v491_v52, %v297_v50  ;;  %v337_v52 = vpop.permute.xlu0 %336 }
  0xfb   : > { %v584_v61 = vmax.f32 %v490_v53, 0.0 }
  0xfc   : > { %v495_v56 = vpop.f32.mrb[2].mxu0  ;;  %v585_v63 = vmax.f32 %v492_v55, 0.0  ;;  %v342_v55 = vpop.permute.xlu1 %341 }
  0xfd   : > { %v496_v57 = vadd.f32 %v495_v56, %v302_v54  ;;  %v497_v58 = vpop.f32.mrb[3].mxu0 }
  0xfe   : > { %v498_v60 = vadd.f32 %v497_v58, %v302_v54 }
  0xff   : > { %v586_v62 = vmax.f32 %v496_v57, 0.0 }
 0x100   : > { %v587_v1 = vmax.f32 %v498_v60, 0.0  ;;  %v501_v2 = vpop.f32.mrb[4].mxu0 }
 0x101   : > { %v503_v3 = vpop.f32.mrb[5].mxu0  ;;  %v933_v4 = vpack.c.bf16 %v586_v62, %v584_v61  ;;  %v502_v6 = vadd.f32 %v501_v2, %v307_v59 }
 0x102   : > { %v931_v5 = vpack.c.bf16 %v587_v1, %v585_v63  ;;  %v504_v8 = vadd.f32 %v503_v3, %v307_v59 }
 0x103   : > { %v588_v13 = vmax.f32 %v502_v6, 0.0 }
 0x104   : > { %v507_v9 = vpop.f32.mrb[6].mxu0  ;;  %932 = vmatprep.subr.bf16.mxu1 %v931_v5  ;;  %v589_v15 = vmax.f32 %v504_v8, 0.0  ;;  %v347_v5 = vpop.permute.xlu0 %346 }
 0x105   : > { %v508_v10 = vadd.f32 %v507_v9, %v312_v7  ;;  %v509_v11 = vpop.f32.mrb[7].mxu0  ;;  %934 = vmatpush1.bf16.msra.mxu1 %v933_v4  ;;  %v352_v8 = vpop.permute.xlu1 %351 }
 0x106   : > { %v510_v12 = vadd.f32 %v509_v11, %v312_v7 }
 0x107   : > { %v590_v14 = vmax.f32 %v508_v10, 0.0 }
 0x108   : > { %v591_v16 = vmax.f32 %v510_v12, 0.0  ;;  %v513_v17 = vpop.f32.mrb[8].mxu0 }
 0x109   : > { %v937_v18 = vpack.c.bf16 %v590_v14, %v588_v13  ;;  %v515_v19 = vpop.f32.mrb[9].mxu0  ;;  %v514_v22 = vadd.f32 %v513_v17, %v317_v20 }
 0x10a   : > { %v935_v21 = vpack.c.bf16 %v591_v16, %v589_v15  ;;  %v516_v24 = vadd.f32 %v515_v19, %v317_v20 }
 0x10b   : > { %v592_v29 = vmax.f32 %v514_v22, 0.0 }
 0x10c   : > { %v519_v25 = vpop.f32.mrb[10].mxu0  ;;  %936 = vmatprep.subr.bf16.mxu1 %v935_v21  ;;  %v593_v31 = vmax.f32 %v516_v24, 0.0  ;;  %v357_v21 = vpop.permute.xlu0 %356 }
 0x10d   : > { %v520_v26 = vadd.f32 %v519_v25, %v322_v23  ;;  %v521_v27 = vpop.f32.mrb[11].mxu0  ;;  %938 = vmatpush1.bf16.msra.mxu1 %v937_v18  ;;  %v362_v24 = vpop.permute.xlu1 %361 }
 0x10e   : > { %v522_v28 = vadd.f32 %v521_v27, %v322_v23 }
 0x10f   : > { %v594_v30 = vmax.f32 %v520_v26, 0.0 }
 0x110   : > { %v595_v32 = vmax.f32 %v522_v28, 0.0  ;;  %v525_v33 = vpop.f32.mrb[12].mxu0 }
 0x111   : > { %v941_v34 = vpack.c.bf16 %v594_v30, %v592_v29  ;;  %v527_v35 = vpop.f32.mrb[13].mxu0  ;;  %v526_v38 = vadd.f32 %v525_v33, %v327_v36 }
 0x112   : > { %v939_v37 = vpack.c.bf16 %v595_v32, %v593_v31  ;;  %v528_v40 = vadd.f32 %v527_v35, %v327_v36 }
 0x113   : > { %v596_v45 = vmax.f32 %v526_v38, 0.0 }
 0x114   : > { %v531_v41 = vpop.f32.mrb[14].mxu0  ;;  %940 = vmatprep.subr.bf16.mxu1 %v939_v37  ;;  %v597_v47 = vmax.f32 %v528_v40, 0.0  ;;  %v367_v37 = vpop.permute.xlu0 %366 }
 0x115   : > { %v532_v42 = vadd.f32 %v531_v41, %v332_v39  ;;  %v533_v43 = vpop.f32.mrb[15].mxu0  ;;  %942 = vmatpush1.bf16.msra.mxu1 %v941_v34  ;;  %v372_v40 = vpop.permute.xlu1 %371 }
 0x116   : > { %v534_v44 = vadd.f32 %v533_v43, %v332_v39 }
 0x117   : > { %v598_v46 = vmax.f32 %v532_v42, 0.0 }
 0x118   : > { %v599_v48 = vmax.f32 %v534_v44, 0.0  ;;  %v537_v49 = vpop.f32.mrb[16].mxu0 }
 0x119   : > { %v945_v50 = vpack.c.bf16 %v598_v46, %v596_v45  ;;  %v539_v51 = vpop.f32.mrb[17].mxu0  ;;  %v538_v54 = vadd.f32 %v537_v49, %v337_v52 }
 0x11a   : > { %v943_v53 = vpack.c.bf16 %v599_v48, %v597_v47  ;;  %v540_v56 = vadd.f32 %v539_v51, %v337_v52  ;;  %v616_v52 = vld [vmem:[%s1449_s3] sm:$0xff] }
 0x11b   : > { %v600_v61 = vmax.f32 %v538_v54, 0.0  ;;  %v618_v54 = vld [vmem:[%s1449_s3 + $0x10] sm:$0xff] }
 0x11c   : > { %v543_v57 = vpop.f32.mrb[18].mxu0  ;;  %944 = vmatprep.subr.bf16.mxu1 %v943_v53  ;;  %v601_v63 = vmax.f32 %v540_v56, 0.0  ;;  %v617_v53 = vld [vmem:[%s1449_s3 + $0x8] sm:$0xff]  ;;  %v627_v56 = vpop.permute.xlu0 %626 }
 0x11d   : > { %v544_v58 = vadd.f32 %v543_v57, %v342_v55  ;;  %v545_v59 = vpop.f32.mrb[19].mxu0  ;;  %946 = vmatpush1.bf16.msra.mxu1 %v945_v50 }
 0x11e   : > { %v546_v60 = vadd.f32 %v545_v59, %v342_v55  ;;  %v619_v55 = vld [vmem:[%s1449_s3 + $0x18] sm:$0xff] }
 0x11f   : > { %v602_v62 = vmax.f32 %v544_v58, 0.0 }
 0x120   : > { %v603_v1 = vmax.f32 %v546_v60, 0.0  ;;  %v549_v2 = vpop.f32.mrb[20].mxu0 }
 0x121   : > { %v949_v3 = vpack.c.bf16 %v602_v62, %v600_v61  ;;  %v551_v4 = vpop.f32.mrb[21].mxu0  ;;  %v550_v7 = vadd.f32 %v549_v2, %v347_v5  ;;  %v632_v62 = vpop.permute.xlu1 %631 }
 0x122   : > { %v947_v6 = vpack.c.bf16 %v603_v1, %v601_v63  ;;  %v552_v9 = vadd.f32 %v551_v4, %v347_v5  ;;  %v637_v5 = vpop.permute.xlu0 %636 }
 0x123   : > { %v604_v14 = vmax.f32 %v550_v7, 0.0 }
 0x124   : > { %v555_v10 = vpop.f32.mrb[22].mxu0  ;;  %948 = vmatprep.subr.bf16.mxu1 %v947_v6  ;;  %v605_v16 = vmax.f32 %v552_v9, 0.0 }
 0x125   : > { %v556_v11 = vadd.f32 %v555_v10, %v352_v8  ;;  %v557_v12 = vpop.f32.mrb[23].mxu0  ;;  %950 = vmatpush1.bf16.msra.mxu1 %v949_v3 }
 0x126   : > { %v558_v13 = vadd.f32 %v557_v12, %v352_v8  ;;  %v642_v12 = vpop.permute.xlu1 %641 }
 0x127   : > { %v606_v15 = vmax.f32 %v556_v11, 0.0 }
 0x128   : > { %v607_v17 = vmax.f32 %v558_v13, 0.0  ;;  %v561_v18 = vpop.f32.mrb[24].mxu0 }
 0x129   : > { %v953_v19 = vpack.c.bf16 %v606_v15, %v604_v14  ;;  %v563_v20 = vpop.f32.mrb[25].mxu0  ;;  %v562_v23 = vadd.f32 %v561_v18, %v357_v21 }
 0x12a   : > { %v951_v22 = vpack.c.bf16 %v607_v17, %v605_v16  ;;  %v564_v25 = vadd.f32 %v563_v20, %v357_v21 }
 0x12b   : > { %v608_v30 = vmax.f32 %v562_v23, 0.0 }
 0x12c   : > { %v567_v26 = vpop.f32.mrb[26].mxu0  ;;  %952 = vmatprep.subr.bf16.mxu1 %v951_v22  ;;  %v609_v32 = vmax.f32 %v564_v25, 0.0 }
 0x12d   : > { %v568_v27 = vadd.f32 %v567_v26, %v362_v24  ;;  %v569_v28 = vpop.f32.mrb[27].mxu0  ;;  %954 = vmatpush1.bf16.msra.mxu1 %v953_v19 }
 0x12e   : > { %v570_v29 = vadd.f32 %v569_v28, %v362_v24 }
 0x12f   : > { %v610_v31 = vmax.f32 %v568_v27, 0.0 }
 0x130   : > { %v611_v33 = vmax.f32 %v570_v29, 0.0  ;;  %v573_v34 = vpop.f32.mrb[28].mxu0 }
 0x131   : > { %v957_v35 = vpack.c.bf16 %v610_v31, %v608_v30  ;;  %v575_v36 = vpop.f32.mrb[29].mxu0  ;;  %v574_v39 = vadd.f32 %v573_v34, %v367_v37 }
 0x132   : > { %v955_v38 = vpack.c.bf16 %v611_v33, %v609_v32  ;;  %v576_v41 = vadd.f32 %v575_v36, %v367_v37 }
 0x133   : > { %v612_v46 = vmax.f32 %v574_v39, 0.0 }
 0x134   : > { %v579_v42 = vpop.f32.mrb[30].mxu0  ;;  %956 = vmatprep.subr.bf16.mxu1 %v955_v38  ;;  %v613_v48 = vmax.f32 %v576_v41, 0.0 }
 0x135   : > { %v580_v43 = vadd.f32 %v579_v42, %v372_v40  ;;  %v581_v44 = vpop.f32.mrb[31].mxu0  ;;  %958 = vmatpush1.bf16.msra.mxu1 %v957_v35 }
 0x136   : > { %v582_v45 = vadd.f32 %v581_v44, %v372_v40 }
 0x137   : > { %v614_v47 = vmax.f32 %v580_v43, 0.0 }
 0x138   : > { %v615_v49 = vmax.f32 %v582_v45, 0.0 }
 0x139   : > { %v961_v50 = vpack.c.bf16 %v614_v47, %v612_v46 }
 0x13a   : > { %v959_v51 = vpack.c.bf16 %v615_v49, %v613_v48 }
 0x13c   : > { %960 = vmatprep.subr.bf16.mxu1 %v959_v51 }
 0x13d   : > { %962 = vmatpush1.bf16.msra.mxu1 %v961_v50 }
 0x140   : > { %709 = vmatmul.mubr.f32.vlgmr.msra.gmra.mrb[0].mxu1 %v616_v52 }
 0x141   : > { %714 = vmatprep.mubr.f32.mxu1 %v1136_v0 }
 0x144   : > { %715 = vmatmul.mubr.f32.gmra.mrb[2].mxu1 %v617_v53 }
 0x145   : > { %720 = vmatprep.mubr.f32.mxu1 %v1136_v0 }
 0x148   : > { %721 = vmatmul.mubr.f32.gmra.mrb[4].mxu1 %v618_v54 }
 0x149   : > { %726 = vmatprep.mubr.f32.mxu1 %v1136_v0 }
 0x14c   : > { %727 = vmatmul.mubr.f32.gmra.mrb[6].mxu1 %v619_v55 }
 0x213   : > { %v710_v57 = vpop.f32.mrb[0].mxu1 }
 0x214   : > { %v711_v58 = vadd.f32 %v710_v57, %v627_v56  ;;  %v712_v59 = vpop.f32.mrb[1].mxu1 }
 0x215   : > { %v713_v60 = vadd.f32 %v712_v59, %v627_v56 }
 0x216   : > { %v908_v61 = vmul.f32 -1.442695, %v711_v58 }
 0x217   : > { %v909_v63 = vmul.f32 -1.442695, %v713_v60  ;;  %v716_v1 = vpop.f32.mrb[2].mxu1 }
 0x218   : > { %1024 = vpow2.f32 %v908_v61  ;;  %v717_v2 = vadd.f32 %v716_v1, %v632_v62  ;;  %v718_v3 = vpop.f32.mrb[3].mxu1 }
 0x219   : > { %1026 = vpow2.f32 %v909_v63  ;;  %v719_v4 = vadd.f32 %v718_v3, %v632_v62 }
 0x21a   : > { %v910_v0 = vmul.f32 -1.442695, %v717_v2 }
 0x21b   : > { %v911_v6 = vmul.f32 -1.442695, %v719_v4  ;;  %v722_v7 = vpop.f32.mrb[4].mxu1 }
 0x21c   : > { %1028 = vpow2.f32 %v910_v0  ;;  %v723_v8 = vadd.f32 %v722_v7, %v637_v5  ;;  %v724_v9 = vpop.f32.mrb[5].mxu1 }
 0x21d   : > { %1030 = vpow2.f32 %v911_v6  ;;  %v725_v10 = vadd.f32 %v724_v9, %v637_v5 }
 0x21e   : > { %v912_v11 = vmul.f32 -1.442695, %v723_v8 }
 0x21f   : > { %v913_v13 = vmul.f32 -1.442695, %v725_v10  ;;  %v728_v14 = vpop.f32.mrb[6].mxu1 }
 0x220   : > { %1032 = vpow2.f32 %v912_v11  ;;  %v729_v15 = vadd.f32 %v728_v14, %v642_v12  ;;  %v730_v16 = vpop.f32.mrb[7].mxu1 }
 0x221   : > { %1034 = vpow2.f32 %v913_v13  ;;  %v731_v17 = vadd.f32 %v730_v16, %v642_v12 }
 0x222   : > { %v1025_v18 = vpop.eup %1024  ;;  %v914_v19 = vmul.f32 -1.442695, %v729_v15 }
 0x223   : > { %v1027_v20 = vpop.eup %1026  ;;  %v757_v21 = vadd.f32 1.0, %v1025_v18  ;;  %v915_v22 = vmul.f32 -1.442695, %v731_v17 }
 0x224   : > { %v758_v23 = vadd.f32 1.0, %v1027_v20  ;;  %1036 = vpow2.f32 %v914_v19 }
 0x225   : > { %1038 = vrcp.f32 %v757_v21 }
 0x226   : > { %v1029_v24 = vpop.eup %1028  ;;  %1040 = vrcp.f32 %v758_v23 }
 0x227   : > { %v1031_v25 = vpop.eup %1030  ;;  %v759_v26 = vadd.f32 1.0, %v1029_v24  ;;  %1042 = vpow2.f32 %v915_v22 }
 0x228   : > { %v760_v27 = vadd.f32 1.0, %v1031_v25 }
 0x229   : > { %1044 = vrcp.f32 %v759_v26 }
 0x22a   : > { %v1033_v28 = vpop.eup %1032  ;;  %1046 = vrcp.f32 %v760_v27 }
 0x22b   : > { %v1035_v29 = vpop.eup %1034  ;;  %v761_v30 = vadd.f32 1.0, %v1033_v28 }
 0x22c   : > { %v762_v31 = vadd.f32 1.0, %v1035_v29 }
 0x22d   : > { %1048 = vrcp.f32 %v761_v30 }
 0x22e   : > { %v1037_v32 = vpop.eup %1036  ;;  %1050 = vrcp.f32 %v762_v31 }
 0x22f   : > { %v1039_v33 = vpop.eup %1038  ;;  %v763_v34 = vadd.f32 1.0, %v1037_v32 }
 0x230   : > { %v1041_v35 = vpop.eup %1040  ;;  %781 = vst [vmem:[%s242_s25] sm:$0xff] %v1039_v33 }
 0x231   : > { %v1043_v36 = vpop.eup %1042  ;;  %782 = vst [vmem:[%s242_s25 + $0x8] sm:$0xff] %v1041_v35  ;;  %1052 = vrcp.f32 %v763_v34 }
 0x232   : > { %v764_v37 = vadd.f32 1.0, %v1043_v36 }
 0x233   : > { %v1045_v38 = vpop.eup %1044 }
 0x234   : > { %v1047_v39 = vpop.eup %1046  ;;  %783 = vst [vmem:[%s242_s25 + $0x10] sm:$0xff] %v1045_v38  ;;  %1054 = vrcp.f32 %v764_v37 }
 0x235   : > { %784 = vst [vmem:[%s242_s25 + $0x18] sm:$0xff] %v1047_v39 }
 0x237   : > { %v1049_v40 = vpop.eup %1048 }
 0x238   : > { %v1051_v41 = vpop.eup %1050  ;;  %785 = vst [vmem:[%s242_s25 + $0x20] sm:$0xff] %v1049_v40 }
 0x239   : > { %786 = vst [vmem:[%s242_s25 + $0x28] sm:$0xff] %v1051_v41 }
 0x23b   : > { %v1053_v42 = vpop.eup %1052 }
 0x23c   : > { %787 = vst [vmem:[%s242_s25 + $0x30] sm:$0xff] %v1053_v42 }
 0x23e   : > { %v1055_v43 = vpop.eup %1054 }
 0x23f   : > { %788 = vst [vmem:[%s242_s25 + $0x38] sm:$0xff] %v1055_v43 }
 0x240   : > { %1069 = shalt.err (!%p1066_p5)
}
 0x241   : > { %s1070_s14 = scalar_lea.hbm %s1394_s9, 1024  ;;  %s1074_s17 = scalar_lea.hbm %s1451_s5, 2048 }
 0x242   : > { %p1071_p6 = scmp.ne.s32.totalorder %s1394_s9, %s1070_s14  ;;  %p1075_p10 = scmp.lt.u32.totalorder %s1394_s9, %s1451_s5 }
 0x243   : > { %p1076_p11 = scmp.lt.u32.totalorder %s1074_s17, %s1070_s14  ;;  %p1078_p13 = scmp.lt.u32.totalorder %s1070_s14, %s1394_s9 }
 0x244   : > { %p1072_p7 = pnand %p1071_p6, %p1211_p4 }
 0x245   : > { %p1077_p12 = por %p1076_p11, %p1075_p10 }
 0x246   : > { %p1073_p9 = pneg %p1072_p7 }
 0x247   : > { %p1079_p0 = por %p1078_p13, %p1077_p12 }
 0x249   : > { %p1080_p1 = pnand %p1079_p0, %p1073_p9 }
 0x24b   : > { %1083 = shalt.err (!%p1080_p1)
}
 0x24c   : > { %s1139_s27 = smov 256   ;;  %s1140_s7 = smov 16  }
 0x24d   : > { %963 = dma.vmem_to_hbm [thread:$0]  (%p1211_p4), %s1396_s29, 1024, %s1394_s9, %s1400_s10, %s1139_s27, %s1139_s27, %s1140_s7  }
 0x24e PF: > { %p969_p2 = scmp.ge.s32.totalorder %s1134_s23, 2  ;;  %s820_s8 = sand.u32 1, %s1114_s18  }
 0x24f   : > { %s821_s11 = scalar_lea.sflag [#allocation3], %s820_s8 }
 0x250   : > { %p966_p3 = pnand %p969_p2, %p1218_p8 }
 0x252   : > { %1109 = dma.done.wait (!%p966_p3), %s821_s11, 1024  }
 0x253   : > { %1111 = vsyncadd (!%p966_p3), %s821_s11, 4294966272  ;;  %s18_s23 = sadd.s32 1, %s1134_s23   ;;  %s1454_s18 = smov %s1118_s19 }
 0x254   : > { %p15_p5 = scmp.ge.s32.totalorder %s18_s23, 4   ;;  %s1455_s19 = smov %s1122_s20 }
 0x255   : > { %s1456_s20 = smov %s1224_s6  ;;  %s1457_s21 = smov %s1130_s22 }
 0x256   : > { %s1458_s22 = smov %s1460_s26  ;;  %17 = sbr.rel (!%p15_p5) target bundleno = 4 (0x4), region = 75 }
 0x25d   :  { %826 = vsyncpa [#allocation3], 1 }
 0x25e   :  { %828 = vsyncpa [#allocation3 + $0x1], 1 }

</bundles_post_ra>
